<compile_context>
chip_gen: v6e
topology: v6e:2x2x1
jax: 0.10.0
libtpu: 0.0.40
codegen_flags: <defaults>
</compile_context>

<pallas_src>
import functools
import math

import jax
import jax.numpy as jnp
from jax.experimental import pallas as pl
from jax.experimental.pallas import tpu as pltpu


# ---------------------------------------------------------------------------
# Fused kernel
# ---------------------------------------------------------------------------
def _make_fused_vae_kernel(n_enc, n_dec, latent_dim):
    """Fused VAE forward.

    Ref order (inputs then outputs):
      x_ref, eps_ref,
      enc_w0, enc_b0, ..., enc_w{n_enc-1}, enc_b{n_enc-1},
      head_w, head_b,                      # lane-padded mu||stddev head
      dec_w0, dec_b0, ..., dec_w{n_dec-1}, dec_b{n_dec-1},
      x_hat_ref, mustd_ref
    """
    n_param_refs = 2 * (n_enc + 1 + n_dec)

    def kernel(x_ref, eps_ref, *refs):
        param_refs = refs[:n_param_refs]
        x_hat_ref, mustd_ref = refs[n_param_refs:]

        def linear(h, w_ref, b_ref, relu):
            # bf16 operands on the MXU, f32 accumulation, f32 epilogue.
            y = jnp.dot(h.astype(w_ref.dtype), w_ref[...],
                        preferred_element_type=jnp.float32)
            y = y + b_ref[...]          # (1, Dout) broadcasts over batch rows
            if relu:
                y = jnp.maximum(y, 0.0)
            return y

        idx = 0
        # ----- encoder -----
        # x_ref is f32 straight from HBM; the single bf16 cast for the MXU
        # happens inside linear() (no f32 round-trip, no wrapper pre-pass).
        h = x_ref[...]
        for _ in range(n_enc):
            h = linear(h, param_refs[idx], param_refs[idx + 1], relu=True)
            idx += 2

        # ----- fused, lane-padded (128-wide) mu || stddev head -----
        mustd = linear(h, param_refs[idx], param_refs[idx + 1], relu=False)
        idx += 2
        mu = mustd[:, :latent_dim]
        std = mustd[:, latent_dim:2 * latent_dim]

        # ----- reparameterize: z = mu + eps * stddev (VPU, fused in-kernel) ---
        z = mu + eps_ref[...] * std

        # ----- decoder (last Linear has no ReLU) -----
        d = z
        for j in range(n_dec):
            d = linear(d, param_refs[idx], param_refs[idx + 1],
                       relu=(j != n_dec - 1))
            idx += 2

        x_hat_ref[...] = d.astype(x_hat_ref.dtype)
        mustd_ref[...] = mustd.astype(mustd_ref.dtype)   # lane-dense 128 store

    return kernel


# ---------------------------------------------------------------------------
# Parameter construction (PyTorch nn.Linear-like init, weights stored (in,out))
# ---------------------------------------------------------------------------
def make_linear_params(key, d_in, d_out):
    kw, kb = jax.random.split(key)
    bound = 1.0 / math.sqrt(d_in)
    w = jax.random.uniform(kw, (d_in, d_out), jnp.float32, -bound, bound)
    b = jax.random.uniform(kb, (d_out,), jnp.float32, -bound, bound)
    return w, b


def build_vae_params(key, input_size, encoder_hidden_dims, latent_dim,
                     decoder_hidden_dims):
    def pack(w, b):
        # weights bf16 for the MXU / half DMA bytes; biases stay f32.
        return w.astype(jnp.bfloat16), b.astype(jnp.float32).reshape(1, -1)

    n_keys = len(encoder_hidden_dims) + len(decoder_hidden_dims) + 3
    keys = jax.random.split(key, n_keys)
    ki = 0
    params = {}

    enc = []
    d_prev = input_size
    for h in encoder_hidden_dims:
        enc.append(pack(*make_linear_params(keys[ki], d_prev, h))); ki += 1
        d_prev = h
    params["encoder"] = enc

    enc_last = encoder_hidden_dims[-1]
    w_mu, b_mu = make_linear_params(keys[ki], enc_last, latent_dim); ki += 1
    w_sd, b_sd = make_linear_params(keys[ki], enc_last, latent_dim); ki += 1
    # Fused mu||stddev head, lane-padded to a multiple of 128 output columns so
    # the store is unmasked/lane-dense.  Padded columns are exactly zero.
    head_out = max(128, -(-2 * latent_dim // 128) * 128)
    w_head = jnp.zeros((enc_last, head_out), jnp.float32)
    w_head = w_head.at[:, :latent_dim].set(w_mu)
    w_head = w_head.at[:, latent_dim:2 * latent_dim].set(w_sd)
    b_head = jnp.zeros((head_out,), jnp.float32)
    b_head = b_head.at[:latent_dim].set(b_mu)
    b_head = b_head.at[latent_dim:2 * latent_dim].set(b_sd)
    params["head"] = pack(w_head, b_head)

    dec = []
    d_prev = latent_dim
    for h in decoder_hidden_dims:
        dec.append(pack(*make_linear_params(keys[ki], d_prev, h))); ki += 1
        d_prev = h
    dec.append(pack(*make_linear_params(keys[ki], decoder_hidden_dims[-1],
                                        input_size))); ki += 1
    params["decoder"] = dec
    return params


# ---------------------------------------------------------------------------
# Batch-tile selection: big tiles, no wrapper pad, >= 2 tiles when feasible
# ---------------------------------------------------------------------------
def _pick_tile_b(B, max_tile=1024):
    """Returns (tile_b, need_pad)."""
    if B > max_tile:
        # Largest candidate tile that divides B exactly (no jnp.pad pre-pass).
        for tb in (1024, 896, 768, 640, 512, 448, 384, 320, 256, 192, 128,
                   64, 32, 16, 8):
            if B % tb == 0:
                return tb, False
        return max_tile, True        # ragged batch: padded-last-tile fallback
    # B <= max_tile: split into two even tiles when possible so both v7x
    # TensorCores get a grid step (sublane constraint: tiles multiple of 8).
    if B >= 512 and B % 16 == 0:
        return B // 2, False
    return B, False


# ---------------------------------------------------------------------------
# Forward pass (mirrors VAE.forward with get_loss=False; also returns mu/std)
# ---------------------------------------------------------------------------
def vae_forward(params, x_nchw, eps, input_dim, *, max_tile_b=1024,
                x_hat_dtype=jnp.bfloat16):
    B = x_nchw.shape[0]
    C, H, W = input_dim
    input_size = C * H * W
    latent_dim = eps.shape[1]
    head_out = params["head"][0].shape[1]

    # nn.Flatten(1): pure reshape (no HBM pass).  x stays f32; the bf16 cast
    # for the MXU happens in-vreg inside the kernel.
    x = x_nchw.reshape(B, input_size).astype(jnp.float32)
    eps = eps.astype(jnp.float32)

    tb, need_pad = _pick_tile_b(B, max_tile_b)
    Bp = B
    if need_pad:
        # TODO(synk): only taken when B has no clean tile divisor; the pad is
        # an extra HBM pass over x/eps — avoided on common batch sizes.
        Bp = -(-B // tb) * tb
        x = jnp.pad(x, ((0, Bp - B), (0, 0)))
        eps = jnp.pad(eps, ((0, Bp - B), (0, 0)))
    num_tiles = Bp // tb

    enc = params["encoder"]
    head = params["head"]
    dec = params["decoder"]

    flat_params = []
    for (w, b) in enc:
        flat_params += [w, b]
    flat_params += [head[0], head[1]]
    for (w, b) in dec:
        flat_params += [w, b]

    in_specs = [
        pl.BlockSpec((tb, input_size), lambda i: (i, 0)),       # x (f32)
        pl.BlockSpec((tb, latent_dim), lambda i: (i, 0)),       # eps (f32)
    ]
    for p in flat_params:                                       # VMEM-resident
        in_specs.append(pl.BlockSpec(p.shape, lambda i: (0, 0)))

    out_specs = [
        pl.BlockSpec((tb, input_size), lambda i: (i, 0)),       # x_hat (flat)
        pl.BlockSpec((tb, head_out), lambda i: (i, 0)),         # mu||std (padded)
    ]
    out_shape = [
        jax.ShapeDtypeStruct((Bp, input_size), x_hat_dtype),
        jax.ShapeDtypeStruct((Bp, head_out), jnp.float32),
    ]

    all_weights = [w for (w, _) in enc] + [head[0]] + [w for (w, _) in dec]
    flops = int(2 * Bp * sum(int(w.shape[0]) * int(w.shape[1])
                             for w in all_weights))
    bytes_accessed = int(
        sum(int(p.size) * p.dtype.itemsize for p in flat_params)
        + int(x.size) * 4                                   # x read (f32)
        + int(eps.size) * 4                                 # eps read (f32)
        + Bp * input_size * jnp.dtype(x_hat_dtype).itemsize  # x_hat write
        + Bp * head_out * 4)                                 # mu||std write

    kernel = _make_fused_vae_kernel(len(enc), len(dec), latent_dim)

    x_hat_flat, mustd = pl.pallas_call(
        kernel,
        out_shape=out_shape,
        grid=(num_tiles,),
        in_specs=in_specs,
        out_specs=out_specs,
        compiler_params=pltpu.CompilerParams(
            dimension_semantics=("parallel",),
            vmem_limit_bytes=48 << 20),     # fits v7x's 64 MiB/TC, covers v5e
        cost_estimate=pl.CostEstimate(
            flops=flops, transcendentals=0, bytes_accessed=bytes_accessed),
    )(x, eps, *flat_params)

    x_hat = x_hat_flat[:B].reshape(B, C, H, W)   # nn.Unflatten(1, input_dim)
    mu = mustd[:B, :latent_dim]
    stddev = mustd[:B, latent_dim:2 * latent_dim]
    # TODO(synk): like the PyTorch module, 'stddev' is a raw Linear output
    # (no exp/softplus); kept as-is to match reference semantics.  x_hat is
    # bf16 by default (kernel already computes in bf16 on the MXU); pass
    # x_hat_dtype=jnp.float32 for full-precision output writes.
    return x_hat, mu, stddev


if __name__ == "__main__":
    # Small shapes consistent with the module: input_dim=(4,16,16) -> 1024.
    input_dim = (4, 16, 16)
    input_size = input_dim[0] * input_dim[1] * input_dim[2]
    encoder_hidden_dims = [128, 64]
    latent_dim = 32
    decoder_hidden_dims = [64, 128]
    batch = 2

    root = jax.random.PRNGKey(0)
    k_params, k_x, k_eps = jax.random.split(root, 3)

    params = build_vae_params(k_params, input_size, encoder_hidden_dims,
                              latent_dim, decoder_hidden_dims)
    x = jax.random.normal(k_x, (batch,) + input_dim, jnp.float32)
    # eps ~ N(0, 1), same shape as stddev (torch.randn_like in reparameterize)
    eps = jax.random.normal(k_eps, (batch, latent_dim), jnp.float32)

    fwd = jax.jit(functools.partial(vae_forward, input_dim=input_dim))
    x_hat, mu, stddev = fwd(params, x, eps)
    jax.block_until_ready(x_hat)

    assert x_hat.shape == (batch,) + input_dim
    assert mu.shape == (batch, latent_dim)
    assert stddev.shape == (batch, latent_dim)
    assert bool(jnp.all(jnp.isfinite(x_hat.astype(jnp.float32))))
    assert bool(jnp.all(jnp.isfinite(mu)))
    assert bool(jnp.all(jnp.isfinite(stddev)))
    print("KERNEL_OK")
</pallas_src>

<mosaic_0001>
module attributes {stable_mosaic.version = 11 : i64} {
  func.func @kernel(%arg0: i32, %arg1: memref<2x1024xf32, #tpu.memory_space<vmem>>, %arg2: memref<2x32xf32, #tpu.memory_space<vmem>>, %arg3: memref<1024x128xbf16, #tpu.memory_space<vmem>>, %arg4: memref<1x128xf32, #tpu.memory_space<vmem>>, %arg5: memref<128x64xbf16, #tpu.memory_space<vmem>>, %arg6: memref<1x64xf32, #tpu.memory_space<vmem>>, %arg7: memref<64x128xbf16, #tpu.memory_space<vmem>>, %arg8: memref<1x128xf32, #tpu.memory_space<vmem>>, %arg9: memref<32x64xbf16, #tpu.memory_space<vmem>>, %arg10: memref<1x64xf32, #tpu.memory_space<vmem>>, %arg11: memref<64x128xbf16, #tpu.memory_space<vmem>>, %arg12: memref<1x128xf32, #tpu.memory_space<vmem>>, %arg13: memref<128x1024xbf16, #tpu.memory_space<vmem>>, %arg14: memref<1x1024xf32, #tpu.memory_space<vmem>>, %arg15: memref<2x1024xbf16, #tpu.memory_space<vmem>>, %arg16: memref<2x128xf32, #tpu.memory_space<vmem>>) attributes {dimension_semantics = [#tpu.dimension_semantics<parallel>], iteration_bounds = array<i64: 1>, scalar_prefetch = 0 : i64, scratch_operands = 0 : i64, tpu.core_type = #tpu.core_type<tc>, window_params = [{transform_indices = @transform_0, window_bounds = array<i64: 2, 1024>}, {transform_indices = @transform_1, window_bounds = array<i64: 2, 32>}, {pipeline_mode = #tpu.pipeline_mode<synchronous>, transform_indices = @transform_2, window_bounds = array<i64: 1024, 128>}, {pipeline_mode = #tpu.pipeline_mode<synchronous>, transform_indices = @transform_3, window_bounds = array<i64: 1, 128>}, {pipeline_mode = #tpu.pipeline_mode<synchronous>, transform_indices = @transform_4, window_bounds = array<i64: 128, 64>}, {pipeline_mode = #tpu.pipeline_mode<synchronous>, transform_indices = @transform_5, window_bounds = array<i64: 1, 64>}, {pipeline_mode = #tpu.pipeline_mode<synchronous>, transform_indices = @transform_6, window_bounds = array<i64: 64, 128>}, {pipeline_mode = #tpu.pipeline_mode<synchronous>, transform_indices = @transform_7, window_bounds = array<i64: 1, 128>}, {pipeline_mode = #tpu.pipeline_mode<synchronous>, transform_indices = @transform_8, window_bounds = array<i64: 32, 64>}, {pipeline_mode = #tpu.pipeline_mode<synchronous>, transform_indices = @transform_9, window_bounds = array<i64: 1, 64>}, {pipeline_mode = #tpu.pipeline_mode<synchronous>, transform_indices = @transform_10, window_bounds = array<i64: 64, 128>}, {pipeline_mode = #tpu.pipeline_mode<synchronous>, transform_indices = @transform_11, window_bounds = array<i64: 1, 128>}, {pipeline_mode = #tpu.pipeline_mode<synchronous>, transform_indices = @transform_12, window_bounds = array<i64: 128, 1024>}, {pipeline_mode = #tpu.pipeline_mode<synchronous>, transform_indices = @transform_13, window_bounds = array<i64: 1, 1024>}, {transform_indices = @transform_14, window_bounds = array<i64: 2, 1024>}, {transform_indices = @transform_15, window_bounds = array<i64: 2, 128>}]} {
    %c0 = arith.constant 0 : index
    %c0_0 = arith.constant 0 : index
    %0 = vector.load %arg1[%c0, %c0_0] : memref<2x1024xf32, #tpu.memory_space<vmem>>, vector<2x1024xf32>
    %1 = arith.truncf %0 : vector<2x1024xf32> to vector<2x1024xbf16>
    %c0_1 = arith.constant 0 : index
    %c0_2 = arith.constant 0 : index
    %2 = vector.load %arg3[%c0_1, %c0_2] : memref<1024x128xbf16, #tpu.memory_space<vmem>>, vector<1024x128xbf16>
    %cst = arith.constant dense<0.000000e+00> : vector<2x128xf32>
    %3 = tpu.matmul %1, %2, %cst {dimension_numbers = #tpu.dot_dimension_numbers<[1], [0], [0], [1], [0, 0, 1, 1], [], []>} : vector<2x1024xbf16>, vector<1024x128xbf16>, vector<2x128xf32> -> vector<2x128xf32>
    %c0_3 = arith.constant 0 : index
    %c0_4 = arith.constant 0 : index
    %4 = vector.load %arg4[%c0_3, %c0_4] : memref<1x128xf32, #tpu.memory_space<vmem>>, vector<1x128xf32>
    %5 = vector.broadcast %4 : vector<1x128xf32> to vector<2x128xf32>
    %6 = arith.addf %3, %5 : vector<2x128xf32>
    %cst_5 = arith.constant 0.000000e+00 : f32
    %7 = vector.broadcast %cst_5 : f32 to vector<2x128xf32>
    %8 = arith.maximumf %6, %7 : vector<2x128xf32>
    %9 = arith.truncf %8 : vector<2x128xf32> to vector<2x128xbf16>
    %c0_6 = arith.constant 0 : index
    %c0_7 = arith.constant 0 : index
    %10 = vector.load %arg5[%c0_6, %c0_7] : memref<128x64xbf16, #tpu.memory_space<vmem>>, vector<128x64xbf16>
    %cst_8 = arith.constant dense<0.000000e+00> : vector<2x64xf32>
    %11 = tpu.matmul %9, %10, %cst_8 {dimension_numbers = #tpu.dot_dimension_numbers<[1], [0], [0], [1], [0, 0, 1, 1], [], []>} : vector<2x128xbf16>, vector<128x64xbf16>, vector<2x64xf32> -> vector<2x64xf32>
    %c0_9 = arith.constant 0 : index
    %c0_10 = arith.constant 0 : index
    %12 = vector.load %arg6[%c0_9, %c0_10] : memref<1x64xf32, #tpu.memory_space<vmem>>, vector<1x64xf32>
    %13 = vector.broadcast %12 : vector<1x64xf32> to vector<2x64xf32>
    %14 = arith.addf %11, %13 : vector<2x64xf32>
    %cst_11 = arith.constant 0.000000e+00 : f32
    %15 = vector.broadcast %cst_11 : f32 to vector<2x64xf32>
    %16 = arith.maximumf %14, %15 : vector<2x64xf32>
    %17 = arith.truncf %16 : vector<2x64xf32> to vector<2x64xbf16>
    %c0_12 = arith.constant 0 : index
    %c0_13 = arith.constant 0 : index
    %18 = vector.load %arg7[%c0_12, %c0_13] : memref<64x128xbf16, #tpu.memory_space<vmem>>, vector<64x128xbf16>
    %cst_14 = arith.constant dense<0.000000e+00> : vector<2x128xf32>
    %19 = tpu.matmul %17, %18, %cst_14 {dimension_numbers = #tpu.dot_dimension_numbers<[1], [0], [0], [1], [0, 0, 1, 1], [], []>} : vector<2x64xbf16>, vector<64x128xbf16>, vector<2x128xf32> -> vector<2x128xf32>
    %c0_15 = arith.constant 0 : index
    %c0_16 = arith.constant 0 : index
    %20 = vector.load %arg8[%c0_15, %c0_16] : memref<1x128xf32, #tpu.memory_space<vmem>>, vector<1x128xf32>
    %21 = vector.broadcast %20 : vector<1x128xf32> to vector<2x128xf32>
    %22 = arith.addf %19, %21 : vector<2x128xf32>
    %23 = vector.extract_strided_slice %22 {offsets = [0, 0], sizes = [2, 32], strides = [1, 1]} : vector<2x128xf32> to vector<2x32xf32>
    %24 = vector.extract_strided_slice %22 {offsets = [0, 32], sizes = [2, 32], strides = [1, 1]} : vector<2x128xf32> to vector<2x32xf32>
    %c0_17 = arith.constant 0 : index
    %c0_18 = arith.constant 0 : index
    %25 = vector.load %arg2[%c0_17, %c0_18] : memref<2x32xf32, #tpu.memory_space<vmem>>, vector<2x32xf32>
    %26 = arith.mulf %25, %24 : vector<2x32xf32>
    %27 = arith.addf %23, %26 : vector<2x32xf32>
    %28 = arith.truncf %27 : vector<2x32xf32> to vector<2x32xbf16>
    %c0_19 = arith.constant 0 : index
    %c0_20 = arith.constant 0 : index
    %29 = vector.load %arg9[%c0_19, %c0_20] : memref<32x64xbf16, #tpu.memory_space<vmem>>, vector<32x64xbf16>
    %cst_21 = arith.constant dense<0.000000e+00> : vector<2x64xf32>
    %30 = tpu.matmul %28, %29, %cst_21 {dimension_numbers = #tpu.dot_dimension_numbers<[1], [0], [0], [1], [0, 0, 1, 1], [], []>} : vector<2x32xbf16>, vector<32x64xbf16>, vector<2x64xf32> -> vector<2x64xf32>
    %c0_22 = arith.constant 0 : index
    %c0_23 = arith.constant 0 : index
    %31 = vector.load %arg10[%c0_22, %c0_23] : memref<1x64xf32, #tpu.memory_space<vmem>>, vector<1x64xf32>
    %32 = vector.broadcast %31 : vector<1x64xf32> to vector<2x64xf32>
    %33 = arith.addf %30, %32 : vector<2x64xf32>
    %cst_24 = arith.constant 0.000000e+00 : f32
    %34 = vector.broadcast %cst_24 : f32 to vector<2x64xf32>
    %35 = arith.maximumf %33, %34 : vector<2x64xf32>
    %36 = arith.truncf %35 : vector<2x64xf32> to vector<2x64xbf16>
    %c0_25 = arith.constant 0 : index
    %c0_26 = arith.constant 0 : index
    %37 = vector.load %arg11[%c0_25, %c0_26] : memref<64x128xbf16, #tpu.memory_space<vmem>>, vector<64x128xbf16>
    %cst_27 = arith.constant dense<0.000000e+00> : vector<2x128xf32>
    %38 = tpu.matmul %36, %37, %cst_27 {dimension_numbers = #tpu.dot_dimension_numbers<[1], [0], [0], [1], [0, 0, 1, 1], [], []>} : vector<2x64xbf16>, vector<64x128xbf16>, vector<2x128xf32> -> vector<2x128xf32>
    %c0_28 = arith.constant 0 : index
    %c0_29 = arith.constant 0 : index
    %39 = vector.load %arg12[%c0_28, %c0_29] : memref<1x128xf32, #tpu.memory_space<vmem>>, vector<1x128xf32>
    %40 = vector.broadcast %39 : vector<1x128xf32> to vector<2x128xf32>
    %41 = arith.addf %38, %40 : vector<2x128xf32>
    %cst_30 = arith.constant 0.000000e+00 : f32
    %42 = vector.broadcast %cst_30 : f32 to vector<2x128xf32>
    %43 = arith.maximumf %41, %42 : vector<2x128xf32>
    %44 = arith.truncf %43 : vector<2x128xf32> to vector<2x128xbf16>
    %c0_31 = arith.constant 0 : index
    %c0_32 = arith.constant 0 : index
    %45 = vector.load %arg13[%c0_31, %c0_32] : memref<128x1024xbf16, #tpu.memory_space<vmem>>, vector<128x1024xbf16>
    %cst_33 = arith.constant dense<0.000000e+00> : vector<2x1024xf32>
    %46 = tpu.matmul %44, %45, %cst_33 {dimension_numbers = #tpu.dot_dimension_numbers<[1], [0], [0], [1], [0, 0, 1, 1], [], []>} : vector<2x128xbf16>, vector<128x1024xbf16>, vector<2x1024xf32> -> vector<2x1024xf32>
    %c0_34 = arith.constant 0 : index
    %c0_35 = arith.constant 0 : index
    %47 = vector.load %arg14[%c0_34, %c0_35] : memref<1x1024xf32, #tpu.memory_space<vmem>>, vector<1x1024xf32>
    %48 = vector.broadcast %47 : vector<1x1024xf32> to vector<2x1024xf32>
    %49 = arith.addf %46, %48 : vector<2x1024xf32>
    %50 = arith.truncf %49 : vector<2x1024xf32> to vector<2x1024xbf16>
    %c0_36 = arith.constant 0 : index
    %c0_37 = arith.constant 0 : index
    %51 = vector.load %arg15[%c0_36, %c0_37] : memref<2x1024xbf16, #tpu.memory_space<vmem>>, vector<2x1024xbf16>
    tpu.vector_store %arg15[%c0_36, %c0_37], %50 {strides = array<i32>} : memref<2x1024xbf16, #tpu.memory_space<vmem>>, vector<2x1024xbf16>,
    %c0_38 = arith.constant 0 : index
    %c0_39 = arith.constant 0 : index
    %52 = vector.load %arg16[%c0_38, %c0_39] : memref<2x128xf32, #tpu.memory_space<vmem>>, vector<2x128xf32>
    tpu.vector_store %arg16[%c0_38, %c0_39], %22 {strides = array<i32>} : memref<2x128xf32, #tpu.memory_space<vmem>>, vector<2x128xf32>,
    return
  }
  func.func @transform_0(%arg0: i32) -> (i32, i32) {
    %c0_i32 = arith.constant 0 : i32
    %c0_i32_0 = arith.constant 0 : i32
    return %arg0, %c0_i32 : i32, i32
  }
  func.func @transform_1(%arg0: i32) -> (i32, i32) {
    %c0_i32 = arith.constant 0 : i32
    %c0_i32_0 = arith.constant 0 : i32
    return %arg0, %c0_i32 : i32, i32
  }
  func.func @transform_2(%arg0: i32) -> (i32, i32) {
    %c0_i32 = arith.constant 0 : i32
    %c0_i32_0 = arith.constant 0 : i32
    %c0_i32_1 = arith.constant 0 : i32
    return %c0_i32, %c0_i32_0 : i32, i32
  }
  func.func @transform_3(%arg0: i32) -> (i32, i32) {
    %c0_i32 = arith.constant 0 : i32
    %c0_i32_0 = arith.constant 0 : i32
    %c0_i32_1 = arith.constant 0 : i32
    return %c0_i32, %c0_i32_0 : i32, i32
  }
  func.func @transform_4(%arg0: i32) -> (i32, i32) {
    %c0_i32 = arith.constant 0 : i32
    %c0_i32_0 = arith.constant 0 : i32
    %c0_i32_1 = arith.constant 0 : i32
    return %c0_i32, %c0_i32_0 : i32, i32
  }
  func.func @transform_5(%arg0: i32) -> (i32, i32) {
    %c0_i32 = arith.constant 0 : i32
    %c0_i32_0 = arith.constant 0 : i32
    %c0_i32_1 = arith.constant 0 : i32
    return %c0_i32, %c0_i32_0 : i32, i32
  }
  func.func @transform_6(%arg0: i32) -> (i32, i32) {
    %c0_i32 = arith.constant 0 : i32
    %c0_i32_0 = arith.constant 0 : i32
    %c0_i32_1 = arith.constant 0 : i32
    return %c0_i32, %c0_i32_0 : i32, i32
  }
  func.func @transform_7(%arg0: i32) -> (i32, i32) {
    %c0_i32 = arith.constant 0 : i32
    %c0_i32_0 = arith.constant 0 : i32
    %c0_i32_1 = arith.constant 0 : i32
    return %c0_i32, %c0_i32_0 : i32, i32
  }
  func.func @transform_8(%arg0: i32) -> (i32, i32) {
    %c0_i32 = arith.constant 0 : i32
    %c0_i32_0 = arith.constant 0 : i32
    %c0_i32_1 = arith.constant 0 : i32
    return %c0_i32, %c0_i32_0 : i32, i32
  }
  func.func @transform_9(%arg0: i32) -> (i32, i32) {
    %c0_i32 = arith.constant 0 : i32
    %c0_i32_0 = arith.constant 0 : i32
    %c0_i32_1 = arith.constant 0 : i32
    return %c0_i32, %c0_i32_0 : i32, i32
  }
  func.func @transform_10(%arg0: i32) -> (i32, i32) {
    %c0_i32 = arith.constant 0 : i32
    %c0_i32_0 = arith.constant 0 : i32
    %c0_i32_1 = arith.constant 0 : i32
    return %c0_i32, %c0_i32_0 : i32, i32
  }
  func.func @transform_11(%arg0: i32) -> (i32, i32) {
    %c0_i32 = arith.constant 0 : i32
    %c0_i32_0 = arith.constant 0 : i32
    %c0_i32_1 = arith.constant 0 : i32
    return %c0_i32, %c0_i32_0 : i32, i32
  }
  func.func @transform_12(%arg0: i32) -> (i32, i32) {
    %c0_i32 = arith.constant 0 : i32
    %c0_i32_0 = arith.constant 0 : i32
    %c0_i32_1 = arith.constant 0 : i32
    return %c0_i32, %c0_i32_0 : i32, i32
  }
  func.func @transform_13(%arg0: i32) -> (i32, i32) {
    %c0_i32 = arith.constant 0 : i32
    %c0_i32_0 = arith.constant 0 : i32
    %c0_i32_1 = arith.constant 0 : i32
    return %c0_i32, %c0_i32_0 : i32, i32
  }
  func.func @transform_14(%arg0: i32) -> (i32, i32) {
    %c0_i32 = arith.constant 0 : i32
    %c0_i32_0 = arith.constant 0 : i32
    return %arg0, %c0_i32 : i32, i32
  }
  func.func @transform_15(%arg0: i32) -> (i32, i32) {
    %c0_i32 = arith.constant 0 : i32
    %c0_i32_0 = arith.constant 0 : i32
    return %arg0, %c0_i32 : i32, i32
  }
}

</mosaic_0001>

<bundles_post_ra>
// kernel: vae_forward.1
= control target key start
LH: loop header
LB: loop body
LE: loop exit
PB: predicated region body
PF: predicated region fallthrough
CT: control target
= control target key end

     0   :  { %21 = vsyncpa [#allocation3], 0  ;;  %s2535_s0 = inlined_call_operand.vmem [shape: f32[2,1024], index: 0, kind: input, shape index: {}]   ;;  %s2536_s1 = inlined_call_operand.vmem [shape: f32[2,32], index: 1, kind: input, shape index: {}]   ;;  %s2537_s2 = inlined_call_operand.hbm [shape: bf16[1024,128], index: 2, kind: input, shape index: {}]   ;;  %s2538_s3 = inlined_call_operand.vmem [shape: f32[1,128], index: 3, kind: input, shape index: {}]   ;;  %s2539_s4 = inlined_call_operand.vmem [shape: bf16[128,64], index: 4, kind: input, shape index: {}]   ;;  %s2540_s5 = inlined_call_operand.vmem [shape: f32[1,64], index: 5, kind: input, shape index: {}]   ;;  %s2541_s6 = inlined_call_operand.vmem [shape: bf16[64,128], index: 6, kind: input, shape index: {}]   ;;  %s2542_s7 = inlined_call_operand.vmem [shape: f32[1,128], index: 7, kind: input, shape index: {}]   ;;  %s2543_s8 = inlined_call_operand.vmem [shape: bf16[32,64], index: 8, kind: input, shape index: {}]   ;;  %s2544_s9 = inlined_call_operand.vmem [shape: f32[1,64], index: 9, kind: input, shape index: {}]   ;;  %s2545_s10 = inlined_call_operand.vmem [shape: bf16[64,128], index: 10, kind: input, shape index: {}]   ;;  %s2546_s11 = inlined_call_operand.vmem [shape: f32[1,128], index: 11, kind: input, shape index: {}]   ;;  %s2547_s12 = inlined_call_operand.hbm [shape: bf16[128,1024], index: 12, kind: input, shape index: {}]   ;;  %s2548_s13 = inlined_call_operand.vmem [shape: f32[1,1024], index: 13, kind: input, shape index: {}]   ;;  %s2549_s14 = inlined_call_operand.vmem [shape: bf16[2,1024], index: 14, kind: output, shape index: {0}]   ;;  %s2550_s15 = inlined_call_operand.vmem [shape: f32[2,128], index: 15, kind: output, shape index: {1}]  }
   0x1   :  { %22 = vsyncpa [#allocation5], 0  ;;  %s2298_s18 = smov [#allocation2]  }
   0x2   :  { %s32_s19 = sshll.u32 %s2298_s18, 4  ;;  %s33_s19 = int_to_ptr.vmem [resolvable:$true] %s32_s19 }
   0x3   :  { %s2262_s20 = scalar_lea.vmem %s33_s19, 8192  ;;  %p2267_p1 = scmp.lt.s32.totalorder %s33_s19, %s33_s19 }
   0x4   :  { %p2263_p0 = scmp.ne.s32.totalorder %s33_s19, %s2262_s20  ;;  %p2268_p2 = scmp.lt.s32.totalorder %s2262_s20, %s2262_s20 }
   0x6   :  { %p2269_p3 = por %p2268_p2, %p2267_p1 }
   0x8   :  { %p2270_p4 = pnand %p2269_p3, %p2263_p0 }
   0xa   :  { %2273 = shalt.err (!%p2270_p4)
}
   0xb   :  { %s2299_s21 = smov 64   ;;  %s2300_s22 = smov 4  }
   0xc   :  { %38 = dma.hbm_to_vmem [thread:$0]  %s2537_s2, 8192, %s33_s19, [#allocation3], %s2299_s21, %s2299_s21, %s2300_s22  }
   0xd   :  { %s2301_s25 = smov [#allocation4]  }
   0xe   :  { %s62_s26 = sshll.u32 %s2301_s25, 4  ;;  %s63_s26 = int_to_ptr.vmem [resolvable:$true] %s62_s26 }
   0xf   :  { %s2282_s27 = scalar_lea.vmem %s63_s26, 8192  ;;  %p2287_p6 = scmp.lt.s32.totalorder %s63_s26, %s63_s26 }
  0x10   :  { %p2283_p5 = scmp.ne.s32.totalorder %s63_s26, %s2282_s27  ;;  %p2288_p7 = scmp.lt.s32.totalorder %s2282_s27, %s2282_s27 }
  0x12   :  { %p2289_p8 = por %p2288_p7, %p2287_p6 }
  0x14   :  { %p2290_p9 = pnand %p2289_p8, %p2283_p5 }
  0x16   :  { %2293 = shalt.err (!%p2290_p9)
}
  0x17   :  { %s2302_s28 = smov 512   ;;  %s2303_s29 = smov 32  }
  0x18   :  { %68 = dma.hbm_to_vmem [thread:$0]  %s2547_s12, 8192, %s63_s26, [#allocation5], %s2302_s28, %s2302_s28, %s2303_s29  }
  0x19   :  { %2294 = dma.done.wait [#allocation3], 8192  }
  0x1a   :  { %2295 = vsyncadd [#allocation3], 4294959104 }
  0x1b   :  { %2296 = dma.done.wait [#allocation5], 8192  }
  0x1c   :  { %2297 = vsyncadd [#allocation5], 4294959104  ;;  %v2170_v0 = vld [vmem:[#allocation2 + $0x78] sm:$0xff]   ;;  %v2174_v4 = vld [vmem:[#allocation2 + $0x70] sm:$0xff]   ;;  %v2304_v22 = vmov 1983009808   ;;  %v86_v24 = vlaneseq }
  0x1d   :  { %v2171_v1 = vld [vmem:[#allocation2 + $0xf8] sm:$0xff]   ;;  %1996 = vmatprep.subr.bf16.mxu0 %v2170_v0  ;;  %v2175_v5 = vld [vmem:[#allocation2 + $0xf0] sm:$0xff]   ;;  %v2178_v8 = vld [vmem:[#allocation2 + $0x68] sm:$0xff]   ;;  %v84_v23 = vunpack.c.l.s4 %v2304_v22  ;;  %vm2306_vm0 = vmmov 0   ;;  %vm965_vm1 = vcmask 523264   ;;  %s2307_s2 = smov 96  }
  0x1e   :  { %v2172_v2 = vld [vmem:[#allocation2 + $0x38] sm:$0xff]   ;;  %2018 = vmatprep.subr.bf16.mxu1 %v2171_v1  ;;  %v2176_v6 = vld [vmem:[#allocation2 + $0x30] sm:$0xff]   ;;  %v2179_v9 = vld [vmem:[#allocation2 + $0xe8] sm:$0xff]   ;;  %v2396_v30 = vshrl.u32 %v86_v24, 7  ;;  %vm1040_vm2 = vcmask 261120  }
  0x1f   :  { %v2173_v3 = vld [vmem:[#allocation2 + $0xb8] sm:$0xff]   ;;  %1997 = vmatpush3.bf16.msra.mxu0 %v2172_v2  ;;  %v2177_v7 = vld [vmem:[#allocation2 + $0xb0] sm:$0xff]   ;;  %v2180_v10 = vld [vmem:[#allocation2 + $0x28] sm:$0xff]   ;;  %v85_v29 = vunpack.c.0.s8 %v84_v23 }
  0x20   :  { %2019 = vmatpush3.bf16.msra.mxu1 %v2173_v3  ;;  %1998 = vmatprep.subr.bf16.mxu0 %v2174_v4  ;;  %v2181_v11 = vld [vmem:[#allocation2 + $0xa8] sm:$0xff]   ;;  %v2182_v12 = vld [vmem:[#allocation2 + $0x60] sm:$0xff]   ;;  %v2186_v16 = vld [vmem:[#allocation2 + $0x58] sm:$0xff]  }
  0x21   :  { %2020 = vmatprep.subr.bf16.mxu1 %v2175_v5  ;;  %v2183_v13 = vld [vmem:[#allocation2 + $0xe0] sm:$0xff]   ;;  %v2187_v17 = vld [vmem:[#allocation2 + $0xd8] sm:$0xff]   ;;  %v2190_v20 = vld [vmem:[#allocation2 + $0x50] sm:$0xff]   ;;  %v2399_v35 = vsub.s32 %v85_v29, %v2396_v30 }
  0x22   :  { %v2184_v14 = vld [vmem:[#allocation2 + $0x20] sm:$0xff]   ;;  %v2188_v18 = vld [vmem:[#allocation2 + $0x18] sm:$0xff]   ;;  %v2191_v21 = vld [vmem:[#allocation2 + $0xd0] sm:$0xff]  }
  0x23   :  { %1999 = vmatpush3.bf16.msra.mxu0 %v2176_v6  ;;  %v2185_v15 = vld [vmem:[#allocation2 + $0xa0] sm:$0xff]   ;;  %v2189_v19 = vld [vmem:[#allocation2 + $0x98] sm:$0xff]   ;;  %v2192_v25 = vld [vmem:[#allocation2 + $0x10] sm:$0xff]  }
  0x24   :  { %2021 = vmatpush3.bf16.msra.mxu1 %v2177_v7  ;;  %2000 = vmatprep.subr.bf16.mxu0 %v2178_v8  ;;  %v2193_v26 = vld [vmem:[#allocation2 + $0x90] sm:$0xff]   ;;  %v2194_v27 = vld [vmem:[#allocation2 + $0x48] sm:$0xff]   ;;  %v2198_v33 = vld [vmem:[#allocation2 + $0x40] sm:$0xff]  }
  0x25   :  { %2022 = vmatprep.subr.bf16.mxu1 %v2179_v9  ;;  %v2195_v28 = vld [vmem:[#allocation2 + $0xc8] sm:$0xff]   ;;  %v2199_v34 = vld [vmem:[#allocation2 + $0xc0] sm:$0xff]   ;;  %v2203_v41 = vld [vmem:[#allocation2 + $0x178] sm:$0xff]  }
  0x26   :  { %v2196_v31 = vld [vmem:[#allocation2 + $0x8] sm:$0xff]   ;;  %v2200_v36 = vld [vmem:[#allocation2] sm:$0xff]   ;;  %v2204_v42 = vld [vmem:[#allocation2 + $0x1f8] sm:$0xff]  }
  0x27   :  { %2001 = vmatpush3.bf16.msra.mxu0 %v2180_v10  ;;  %v2197_v32 = vld [vmem:[#allocation2 + $0x88] sm:$0xff]   ;;  %v2201_v37 = vld [vmem:[#allocation2 + $0x80] sm:$0xff]   ;;  %v2205_v46 = vld [vmem:[#allocation2 + $0x138] sm:$0xff]  }
  0x28   :  { %2023 = vmatpush3.bf16.msra.mxu1 %v2181_v11  ;;  %2002 = vmatprep.subr.bf16.mxu0 %v2182_v12  ;;  %v78_v38 = vld [vmem:[%s2535_s0] sm:$0xff]  ;;  %v2206_v49 = vld [vmem:[#allocation2 + $0x1b8] sm:$0xff]   ;;  %v2207_v51 = vld [vmem:[#allocation2 + $0x170] sm:$0xff]  }
  0x29   :  { %2024 = vmatprep.subr.bf16.mxu1 %v2183_v13  ;;  %v89_v39 = vrot.slane %v78_v38, %v2399_v35  ;;  %v82_v40 = vcombine.high %v78_v38, %v78_v38  ;;  %v2208_v53 = vld [vmem:[#allocation2 + $0x1f0] sm:$0xff]   ;;  %v2211_v56 = vld [vmem:[#allocation2 + $0x168] sm:$0xff]   ;;  %v2215_v60 = vld [vmem:[#allocation2 + $0x160] sm:$0xff]  }
  0x2a   :  { %v2209_v54 = vld [vmem:[#allocation2 + $0x130] sm:$0xff]   ;;  %v2212_v57 = vld [vmem:[#allocation2 + $0x1e8] sm:$0xff]   ;;  %v2216_v61 = vld [vmem:[#allocation2 + $0x1e0] sm:$0xff]  }
  0x2b   :  { %2003 = vmatpush3.bf16.msra.mxu0 %v2184_v14  ;;  %v97_v43 = vcombine.high %v89_v39, %v89_v39  ;;  %v96_v44 = vrot.slane %v82_v40, %v2399_v35  ;;  %v124_v45 = vpack.c.bf16 %v89_v39, %v89_v39  ;;  %v2210_v55 = vld [vmem:[#allocation2 + $0x1b0] sm:$0xff]   ;;  %v2213_v58 = vld [vmem:[#allocation2 + $0x128] sm:$0xff]   ;;  %v2217_v62 = vld [vmem:[#allocation2 + $0x120] sm:$0xff]  }
  0x2c   :  { %2025 = vmatpush3.bf16.msra.mxu1 %v2185_v15  ;;  %2004 = vmatprep.subr.bf16.mxu0 %v2186_v16  ;;  %v2214_v59 = vld [vmem:[#allocation2 + $0x1a8] sm:$0xff]   ;;  %v2218_v63 = vld [vmem:[#allocation2 + $0x1a0] sm:$0xff]   ;;  %v2219_v0 = vld [vmem:[#allocation2 + $0x158] sm:$0xff]  }
  0x2d   :  { %2026 = vmatprep.subr.bf16.mxu1 %v2187_v17  ;;  %v125_v47 = vpack.c.bf16 %v97_v43, %v97_v43  ;;  %v98_v48 = vcombine.high %v96_v44, %v96_v44  ;;  %v126_v50 = vpack.c.bf16 %v96_v44, %v96_v44  ;;  %v2220_v1 = vld [vmem:[#allocation2 + $0x1d8] sm:$0xff]   ;;  %v2223_v4 = vld [vmem:[#allocation2 + $0x150] sm:$0xff]   ;;  %v2227_v8 = vld [vmem:[#allocation2 + $0x148] sm:$0xff]  }
  0x2e   :  { %v2221_v2 = vld [vmem:[#allocation2 + $0x118] sm:$0xff]   ;;  %v2224_v5 = vld [vmem:[#allocation2 + $0x1d0] sm:$0xff]   ;;  %v2228_v9 = vld [vmem:[#allocation2 + $0x1c8] sm:$0xff]  }
  0x2f   :  { %2005 = vmatpush3.bf16.msra.mxu0 %v2188_v18  ;;  %683 = vmatprep.mubr.bf16.mxu0 %v125_v47  ;;  %v127_v52 = vpack.c.bf16 %v98_v48, %v98_v48  ;;  %v2222_v3 = vld [vmem:[#allocation2 + $0x198] sm:$0xff]   ;;  %v2225_v6 = vld [vmem:[#allocation2 + $0x110] sm:$0xff]   ;;  %v2229_v10 = vld [vmem:[#allocation2 + $0x108] sm:$0xff]  }
  0x30   :  { %2027 = vmatpush3.bf16.msra.mxu1 %v2189_v19  ;;  %2006 = vmatprep.subr.bf16.mxu0 %v2190_v20  ;;  %v2226_v7 = vld [vmem:[#allocation2 + $0x190] sm:$0xff]   ;;  %v2230_v11 = vld [vmem:[#allocation2 + $0x188] sm:$0xff]   ;;  %v2231_v12 = vld [vmem:[#allocation2 + $0x140] sm:$0xff]  }
  0x31   :  { %2028 = vmatprep.subr.bf16.mxu1 %v2191_v21  ;;  %723 = vmatprep.mubr.bf16.mxu1 %v127_v52  ;;  %v2232_v13 = vld [vmem:[#allocation2 + $0x1c0] sm:$0xff]   ;;  %v79_v15 = vld [vmem:[%s2535_s0 + $0x8] sm:$0xff] }
  0x32   :  { %v2233_v14 = vld [vmem:[#allocation2 + $0x100] sm:$0xff]   ;;  %v106_v17 = vrot.slane %v79_v15, %v2399_v35  ;;  %v99_v18 = vcombine.high %v79_v15, %v79_v15  ;;  %v2238_v29 = vld [vmem:[%s2539_s4 + $0x28] sm:$0xff]  }
  0x33   :  { %2007 = vmatpush3.bf16.msra.mxu0 %v2192_v25  ;;  %v2234_v16 = vld [vmem:[#allocation2 + $0x180] sm:$0xff]  }
  0x34   :  { %2029 = vmatpush3.bf16.msra.mxu1 %v2193_v26  ;;  %2008 = vmatprep.subr.bf16.mxu0 %v2194_v27  ;;  %v114_v19 = vcombine.high %v106_v17, %v106_v17  ;;  %v113_v20 = vrot.slane %v99_v18, %v2399_v35  ;;  %v128_v21 = vpack.c.bf16 %v106_v17, %v106_v17  ;;  %v2236_v26 = vld [vmem:[%s2539_s4 + $0x38] sm:$0xff]   ;;  %v2305_v27 = vmov 0.0   ;;  %v2243_v35 = vld [vmem:[%s2539_s4] sm:$0xff]  }
  0x35   :  { %2030 = vmatprep.subr.bf16.mxu1 %v2195_v28  ;;  %v2237_v28 = vld [vmem:[%s2539_s4 + $0x30] sm:$0xff]   ;;  %v1838_v47 = vld [vmem:[%s2538_s3] ss:$0 sm:$0xff] }
  0x36   :  { %v129_v22 = vpack.c.bf16 %v114_v19, %v114_v19  ;;  %v115_v23 = vcombine.high %v113_v20, %v113_v20  ;;  %v130_v24 = vpack.c.bf16 %v113_v20, %v113_v20  ;;  %v1009_v19 = vld [vmem:[%s2536_s1] sm:$0x3] }
  0x37   :  { %2009 = vmatpush3.bf16.msra.mxu0 %v2196_v31  ;;  %v2239_v31 = vld [vmem:[%s2539_s4 + $0x20] sm:$0xff]  }
  0x38   :  { %2031 = vmatpush3.bf16.msra.mxu1 %v2197_v32  ;;  %2010 = vmatprep.subr.bf16.mxu0 %v2198_v33  ;;  %v131_v25 = vpack.c.bf16 %v115_v23, %v115_v23  ;;  %v2240_v32 = vld [vmem:[%s2539_s4 + $0x18] sm:$0xff]   ;;  %v2241_v33 = vld [vmem:[%s2539_s4 + $0x10] sm:$0xff]  }
  0x39   :  { %2032 = vmatprep.subr.bf16.mxu1 %v2199_v34  ;;  %v2242_v34 = vld [vmem:[%s2539_s4 + $0x8] sm:$0xff]   ;;  %v2250_v23 = vld [vmem:[%s2545_s10 + $0x18] sm:$0xff]  }
  0x3b   :  { %2011 = vmatpush3.bf16.msra.mxu0 %v2200_v36  ;;  %v2244_v36 = vld [vmem:[%s2541_s6 + $0x18] sm:$0xff]  }
  0x3c   :  { %2033 = vmatpush3.bf16.msra.mxu1 %v2201_v37  ;;  %2040 = vmatprep.subr.bf16.mxu0 %v2203_v41  ;;  %v2245_v37 = vld [vmem:[%s2541_s6 + $0x10] sm:$0xff]  }
  0x3d   :  { %2062 = vmatprep.subr.bf16.mxu1 %v2204_v42 }
  0x3e   :  { %684 = vmatmul.mubr.bf16.vlgmr.msra.gmra.mxu0 %v124_v45 }
  0x3f   :  { %2041 = vmatpush3.bf16.msra.mxu0 %v2205_v46  ;;  %724 = vmatmul.mubr.bf16.vlgmr.msra.gmra.mxu1 %v126_v50 }
  0x40   :  { %2042 = vmatprep.subr.bf16.mxu0 %v2207_v51  ;;  %2063 = vmatpush3.bf16.msra.mxu1 %v2206_v49 }
  0x41   :  { %2064 = vmatprep.subr.bf16.mxu1 %v2208_v53  ;;  %763 = vmatprep.mubr.bf16.mxu0 %v129_v22 }
  0x42   :  { %803 = vmatprep.mubr.bf16.mxu1 %v131_v25  ;;  %v2251_v25 = vld [vmem:[%s2545_s10 + $0x10] sm:$0xff]  }
  0x43   :  { %2043 = vmatpush3.bf16.msra.mxu0 %v2209_v54 }
  0x44   :  { %2044 = vmatprep.subr.bf16.mxu0 %v2211_v56  ;;  %2065 = vmatpush3.bf16.msra.mxu1 %v2210_v55 }
  0x45   :  { %2066 = vmatprep.subr.bf16.mxu1 %v2212_v57 }
  0x47   :  { %2045 = vmatpush3.bf16.msra.mxu0 %v2213_v58 }
  0x48   :  { %2046 = vmatprep.subr.bf16.mxu0 %v2215_v60  ;;  %2067 = vmatpush3.bf16.msra.mxu1 %v2214_v59 }
  0x49   :  { %2068 = vmatprep.subr.bf16.mxu1 %v2216_v61 }
  0x4b   :  { %2047 = vmatpush3.bf16.msra.mxu0 %v2217_v62 }
  0x4c   :  { %2048 = vmatprep.subr.bf16.mxu0 %v2219_v0  ;;  %2069 = vmatpush3.bf16.msra.mxu1 %v2218_v63 }
  0x4d   :  { %2070 = vmatprep.subr.bf16.mxu1 %v2220_v1  ;;  %v2246_v1 = vld [vmem:[%s2541_s6 + $0x8] sm:$0xff]  }
  0x4f   :  { %2049 = vmatpush3.bf16.msra.mxu0 %v2221_v2  ;;  %v2247_v2 = vld [vmem:[%s2541_s6] sm:$0xff]  }
  0x50   :  { %2050 = vmatprep.subr.bf16.mxu0 %v2223_v4  ;;  %2071 = vmatpush3.bf16.msra.mxu1 %v2222_v3  ;;  %v1903_v3 = vld [vmem:[%s2540_s5] ss:$0 sm:$0xff] }
  0x51   :  { %2072 = vmatprep.subr.bf16.mxu1 %v2224_v5 }
  0x53   :  { %2051 = vmatpush3.bf16.msra.mxu0 %v2225_v6 }
  0x54   :  { %2052 = vmatprep.subr.bf16.mxu0 %v2227_v8  ;;  %2073 = vmatpush3.bf16.msra.mxu1 %v2226_v7 }
  0x55   :  { %2074 = vmatprep.subr.bf16.mxu1 %v2228_v9 }
  0x57   :  { %2053 = vmatpush3.bf16.msra.mxu0 %v2229_v10 }
  0x58   :  { %2054 = vmatprep.subr.bf16.mxu0 %v2231_v12  ;;  %2075 = vmatpush3.bf16.msra.mxu1 %v2230_v11  ;;  %v2248_v11 = vld [vmem:[%s2543_s8 + $0x8] sm:$0xff]   ;;  %v2249_v12 = vld [vmem:[%s2543_s8] sm:$0xff]  }
  0x59   :  { %2076 = vmatprep.subr.bf16.mxu1 %v2232_v13  ;;  %v1912_v13 = vld [vmem:[%s2542_s7] ss:$0 sm:$0xff] }
  0x5b   :  { %2055 = vmatpush3.bf16.msra.mxu0 %v2233_v14 }
  0x5c   :  { %2077 = vmatpush3.bf16.msra.mxu1 %v2234_v16  ;;  %2106 = vmatprep.subr.bf16.mxu0 %v2305_v27 }
  0x5d   :  { %2126 = vmatprep.subr.bf16.mxu1 %v2305_v27 }
  0x5e   :  { %764 = vmatmul.mubr.bf16.vlgmr.msra.gmra.mxu0 %v128_v21 }
  0x5f   :  { %804 = vmatmul.mubr.bf16.vlgmr.msra.gmra.mxu1 %v130_v24  ;;  %2107 = vmatpush3.bf16.msra.mxu0 %v2236_v26  ;;  %v2252_v26 = vld [vmem:[%s2545_s10 + $0x8] sm:$0xff]  }
  0x60   :  { %2108 = vmatprep.subr.bf16.mxu0 %v2305_v27  ;;  %2122 = vmatprep.mubr.msk.bf16.mxu0 %vm2306_vm0, %v2305_v27 }
  0x61   :  { %2134 = vmatprep.mubr.msk.bf16.mxu1 %vm2306_vm0, %v2305_v27  ;;  %2127 = vmatpush3.bf16.msra.mxu1 %v2244_v36  ;;  %v1218_v36 = vld [vmem:[#allocation4 + $0x180] sm:$0xff] }
  0x62   :  { %2128 = vmatprep.subr.bf16.mxu1 %v2305_v27 }
  0x63   :  { %2109 = vmatpush3.bf16.msra.mxu0 %v2237_v28  ;;  %v2253_v28 = vld [vmem:[%s2545_s10] sm:$0xff]  }
  0x64   :  { %2110 = vmatprep.subr.bf16.mxu0 %v2305_v27 }
  0x65   :  { %2129 = vmatpush3.bf16.msra.mxu1 %v2245_v37  ;;  %v1222_v37 = vld [vmem:[#allocation4 + $0x1a0] sm:$0xff] }
  0x66   :  { %2130 = vmatprep.subr.bf16.mxu1 %v2305_v27 }
  0x67   :  { %2111 = vmatpush3.bf16.msra.mxu0 %v2238_v29  ;;  %v1226_v29 = vld [vmem:[#allocation4 + $0x1c0] sm:$0xff] }
  0x68   :  { %2112 = vmatprep.subr.bf16.mxu0 %v2305_v27 }
  0x69   :  { %2131 = vmatpush3.bf16.msra.mxu1 %v2246_v1  ;;  %v1219_v1 = vld [vmem:[#allocation4 + $0x188] sm:$0xff] }
  0x6a   :  { %2132 = vmatprep.subr.bf16.mxu1 %v2305_v27 }
  0x6b   :  { %2113 = vmatpush3.bf16.msra.mxu0 %v2239_v31  ;;  %v1230_v31 = vld [vmem:[#allocation4 + $0x1e0] sm:$0xff] }
  0x6c   :  { %2114 = vmatprep.subr.bf16.mxu0 %v2305_v27 }
  0x6d   :  { %2133 = vmatpush3.bf16.msra.mxu1 %v2247_v2  ;;  %v1223_v2 = vld [vmem:[#allocation4 + $0x1a8] sm:$0xff] }
  0x6e   :  { %2138 = vmatprep.subr.bf16.mxu1 %v2305_v27 }
  0x6f   :  { %2115 = vmatpush3.bf16.msra.mxu0 %v2240_v32  ;;  %v1227_v32 = vld [vmem:[#allocation4 + $0x1c8] sm:$0xff] }
  0x70   :  { %2116 = vmatprep.subr.bf16.mxu0 %v2305_v27 }
  0x73   :  { %2117 = vmatpush3.bf16.msra.mxu0 %v2241_v33  ;;  %v1984_v33 = vcombine.low %v1226_v29, %v1230_v31 }
  0x74   :  { %2118 = vmatprep.subr.bf16.mxu0 %v2305_v27 }
  0x77   :  { %2119 = vmatpush3.bf16.msra.mxu0 %v2242_v34  ;;  %v1985_v34 = vcombine.high %v1226_v29, %v1230_v31  ;;  %v1170_v31 = vld [vmem:[#allocation4] sm:$0xff] }
  0x78   :  { %2120 = vmatprep.subr.bf16.mxu0 %v2305_v27 }
  0x7b   :  { %2121 = vmatpush3.bf16.msra.mxu0 %v2243_v35  ;;  %v1231_v35 = vld [vmem:[#allocation4 + $0x1e8] sm:$0xff] }
  0x7c   :  { %1596 = vmatprep.subr.bf16.mxu0 %v1985_v34 }
  0xfe   :  { %v2012_v38 = vpop.f32.mrf.mxu0 }
  0xff   :  { %v2034_v39 = vpop.f32.mrf.mxu1 }
 0x100   :  { %v2013_v40 = vpop.f32.mrf.mxu0 }
 0x101   :  { %v2035_v41 = vpop.f32.mrf.mxu1  ;;  %v2014_v46 = vadd.f32 %v2013_v40, %v2012_v38  ;;  %v1986_v38 = vcombine.low %v1227_v32, %v1231_v35  ;;  %v1977_v40 = vcombine.high %v1218_v36, %v1222_v37 }
 0x102   :  { %v2015_v42 = vpop.f32.mrf.mxu0  ;;  %v2036_v49 = vadd.f32 %v2035_v41, %v2034_v39  ;;  %v1987_v39 = vcombine.high %v1227_v32, %v1231_v35  ;;  %v1210_v41 = vld [vmem:[#allocation4 + $0x140] sm:$0xff]  ;;  %v1175_v35 = vld [vmem:[#allocation4 + $0x28] sm:$0xff] }
 0x103   :  { %v2037_v43 = vpop.f32.mrf.mxu1  ;;  %v686_v48 = vadd.f32 %v2014_v46, %v1838_v47  ;;  %v1214_v42 = vld [vmem:[#allocation4 + $0x160] sm:$0xff] }
 0x104   :  { %v2016_v44 = vpop.f32.mrf.mxu0  ;;  %v1969_v43 = vcombine.high %v1210_v41, %v1214_v42  ;;  %v1206_v46 = vld [vmem:[#allocation4 + $0x120] sm:$0xff] }
 0x105   :  { %v2038_v45 = vpop.f32.mrf.mxu1  ;;  %v726_v53 = vadd.f32 %v2036_v49, %v686_v48  ;;  %v1968_v44 = vcombine.low %v1210_v41, %v1214_v42  ;;  %v1194_v49 = vld [vmem:[#allocation4 + $0xc0] sm:$0xff] }
 0x106   :  { %v1202_v45 = vld [vmem:[#allocation4 + $0x100] sm:$0xff] }
 0x107   :  { %v1961_v47 = vcombine.high %v1202_v45, %v1206_v46  ;;  %v1960_v48 = vcombine.low %v1202_v45, %v1206_v46  ;;  %v1174_v32 = vld [vmem:[#allocation4 + $0x20] sm:$0xff] }
 0x108   :  { %v1929_v34 = vcombine.high %v1170_v31, %v1174_v32 }
 0x11e   :  { %v2056_v50 = vpop.f32.mrf.mxu0 }
 0x11f   :  { %v2078_v51 = vpop.f32.mrf.mxu1 }
 0x120   :  { %v2057_v52 = vpop.f32.mrf.mxu0 }
 0x121   :  { %v2058_v54 = vadd.f32 %v2057_v52, %v2056_v50  ;;  %v2079_v55 = vpop.f32.mrf.mxu1  ;;  %v1198_v50 = vld [vmem:[#allocation4 + $0xe0] sm:$0xff] }
 0x122   :  { %v2059_v56 = vpop.f32.mrf.mxu0  ;;  %v2080_v58 = vadd.f32 %v2079_v55, %v2078_v51  ;;  %v1953_v51 = vcombine.high %v1194_v49, %v1198_v50  ;;  %v1952_v52 = vcombine.low %v1194_v49, %v1198_v50  ;;  %v1220_v50 = vld [vmem:[#allocation4 + $0x190] sm:$0xff] }
 0x123   :  { %v766_v57 = vadd.f32 %v2058_v54, %v726_v53  ;;  %v2081_v59 = vpop.f32.mrf.mxu1  ;;  %v1186_v53 = vld [vmem:[#allocation4 + $0x80] sm:$0xff] }
 0x124   :  { %v2060_v60 = vpop.f32.mrf.mxu0  ;;  %v1190_v54 = vld [vmem:[#allocation4 + $0xa0] sm:$0xff] }
 0x125   :  { %v806_v61 = vadd.f32 %v2080_v58, %v766_v57  ;;  %v2082_v62 = vpop.f32.mrf.mxu1  ;;  %v1945_v55 = vcombine.high %v1186_v53, %v1190_v54  ;;  %v1944_v56 = vcombine.low %v1186_v53, %v1190_v54  ;;  %v1178_v57 = vld [vmem:[#allocation4 + $0x40] sm:$0xff]  ;;  %v1221_v53 = vld [vmem:[#allocation4 + $0x198] sm:$0xff] }
 0x126   :  { %v1182_v58 = vld [vmem:[#allocation4 + $0x60] sm:$0xff]  ;;  %v1225_v54 = vld [vmem:[#allocation4 + $0x1b8] sm:$0xff] }
 0x127   :  { %v811_v63 = vmax.f32 %v806_v61, 0.0  ;;  %v1937_v59 = vcombine.high %v1178_v57, %v1182_v58  ;;  %v1936_v60 = vcombine.low %v1178_v57, %v1182_v58  ;;  %v1918_v61 = vld [vmem:[%s2544_s9] ss:$0 sm:$0xff] }
 0x129   :  { %v812_v0 = vpack.c.bf16 %v811_v63, %v811_v63 }
 0x12b   :  { %2123 = vmatmul.mubr.bf16.vlgmr.msra.gmra.mxu0 %v812_v0 }
 0x12c   :  { %1597 = vmatpush1.bf16.msra.mxu0 %v1984_v33  ;;  %v1171_v33 = vld [vmem:[#allocation4 + $0x8] sm:$0xff] }
 0x12d   :  { %1598 = vmatprep.subr.bf16.mxu0 %v1977_v40  ;;  %v1232_v40 = vld [vmem:[#allocation4 + $0x1f0] sm:$0xff] }
 0x1eb   :  { %v918_v4 = vpop.f32.mrf.mxu0 }
 0x1ec   :  { %v919_v5 = vadd.f32 %v1903_v3, %v918_v4 }
 0x1ed   :  { %v2124_v6 = vpop.f32.mrf.mxu0 }
 0x1ee   :  { %v924_v7 = vmax.f32 %v919_v5, 0.0  ;;  %v1979_v6 = vcombine.high %v1219_v1, %v1223_v2 }
 0x1ef   :  { %v921_v8 = vpop.f32.mrf.mxu0 }
 0x1f0   :  { %v925_v9 = vpack.c.bf16 %v924_v7, %v924_v7  ;;  %v1211_v8 = vld [vmem:[#allocation4 + $0x148] sm:$0xff] }
 0x1f1   :  { %v2125_v10 = vpop.f32.mrf.mxu0 }
 0x1f2   :  { %2135 = vmatmul.mubr.msk.bf16.vlgmr.msra.gmra.mxu1 %vm965_vm1, %v925_v9  ;;  %v1215_v9 = vld [vmem:[#allocation4 + $0x168] sm:$0xff]  ;;  %v1978_v10 = vcombine.low %v1219_v1, %v1223_v2  ;;  %v1982_v2 = vcombine.low %v1221_v53, %v1225_v54 }
 0x1f3   :  { %2142 = vmatprep.mubr.msk.bf16.mxu1 %vm2306_vm0, %v2305_v27  ;;  %2139 = vmatpush3.bf16.msra.mxu1 %v2248_v11  ;;  %v1971_v11 = vcombine.high %v1211_v8, %v1215_v9 }
 0x1f4   :  { %2140 = vmatprep.subr.bf16.mxu1 %v2305_v27 }
 0x1f7   :  { %2141 = vmatpush3.bf16.msra.mxu1 %v2249_v12  ;;  %v1203_v12 = vld [vmem:[#allocation4 + $0x108] sm:$0xff] }
 0x1f8   :  { %2146 = vmatprep.subr.bf16.mxu1 %v2305_v27 }
 0x2b2   :  { %v1003_v14 = vpop.f32.mrf.mxu1 }
 0x2b3   :  { %v1004_v15 = vadd.f32 %v1912_v13, %v1003_v14  ;;  %v1207_v13 = vld [vmem:[#allocation4 + $0x128] sm:$0xff]  ;;  %v1970_v14 = vcombine.low %v1211_v8, %v1215_v9  ;;  %v1209_v8 = vld [vmem:[#allocation4 + $0x138] sm:$0xff] }
 0x2b4   :  { %v2136_v16 = vpop.f32.mrf.mxu1 }
 0x2b5   :  { %1827 = vst [vmem:[%s2550_s15] sm:$0x3] %v1004_v15  ;;  %1011 = vrot.lane.b32.xlu0 %v1004_v15, %s2307_s2  ;;  %v1195_v16 = vld [vmem:[#allocation4 + $0xc8] sm:$0xff] }
 0x2b6   :  { %v1006_v17 = vpop.f32.mrf.mxu1 }
 0x2b7   :  { %v1199_v17 = vld [vmem:[#allocation4 + $0xe8] sm:$0xff] }
 0x2b8   :  { %v2137_v18 = vpop.f32.mrf.mxu1 }
 0x2b9   :  { %v1962_v18 = vcombine.low %v1203_v12, %v1207_v13 }
 0x327   :  { %v1012_v20 = vpop.permute.xlu0 %1011 }
 0x328   :  { %v1014_v21 = vmul.f32 %v1012_v20, %v1009_v19  ;;  %v1955_v19 = vcombine.high %v1195_v16, %v1199_v17  ;;  %v1187_v20 = vld [vmem:[#allocation4 + $0x88] sm:$0xff] }
 0x32a   :  { %v1015_v22 = vadd.f32 %v1014_v21, %v1004_v15  ;;  %v1963_v15 = vcombine.high %v1203_v12, %v1207_v13  ;;  %v1191_v21 = vld [vmem:[#allocation4 + $0xa8] sm:$0xff]  ;;  %v1196_v13 = vld [vmem:[#allocation4 + $0xd0] sm:$0xff] }
 0x32c   :  { %v1016_v24 = vpack.c.bf16 %v1015_v22, %v1015_v22  ;;  %v1954_v22 = vcombine.low %v1195_v16, %v1199_v17  ;;  %v1201_v16 = vld [vmem:[#allocation4 + $0xf8] sm:$0xff] }
 0x32e   :  { %2143 = vmatmul.mubr.msk.bf16.vlgmr.msra.gmra.mxu1 %vm1040_vm2, %v1016_v24  ;;  %v1179_v24 = vld [vmem:[#allocation4 + $0x48] sm:$0xff] }
 0x32f   :  { %2147 = vmatpush3.bf16.msra.mxu1 %v2250_v23  ;;  %2154 = vmatprep.mubr.msk.bf16.mxu1 %vm2306_vm0, %v2305_v27  ;;  %v1947_v23 = vcombine.high %v1187_v20, %v1191_v21 }
 0x330   :  { %2148 = vmatprep.subr.bf16.mxu1 %v2305_v27 }
 0x333   :  { %2149 = vmatpush3.bf16.msra.mxu1 %v2251_v25  ;;  %v1183_v25 = vld [vmem:[#allocation4 + $0x68] sm:$0xff] }
 0x334   :  { %2150 = vmatprep.subr.bf16.mxu1 %v2305_v27  ;;  %v1938_v29 = vcombine.low %v1179_v24, %v1183_v25 }
 0x337   :  { %2151 = vmatpush3.bf16.msra.mxu1 %v2252_v26  ;;  %v1946_v26 = vcombine.low %v1187_v20, %v1191_v21  ;;  %v1188_v21 = vld [vmem:[#allocation4 + $0x90] sm:$0xff] }
 0x338   :  { %2152 = vmatprep.subr.bf16.mxu1 %v2305_v27  ;;  %v1976_v27 = vcombine.low %v1218_v36, %v1222_v37  ;;  %v1928_v36 = vcombine.low %v1170_v31, %v1174_v32  ;;  %v1930_v37 = vcombine.low %v1171_v33, %v1175_v35  ;;  %v1180_v31 = vld [vmem:[#allocation4 + $0x50] sm:$0xff] }
 0x339   :  { %v1184_v32 = vld [vmem:[#allocation4 + $0x70] sm:$0xff] }
 0x33a   :  { %1599 = vmatpush1.bf16.msra.mxu0 %v1976_v27  ;;  %v1229_v27 = vld [vmem:[#allocation4 + $0x1d8] sm:$0xff] }
 0x33b   :  { %2153 = vmatpush3.bf16.msra.mxu1 %v2253_v28  ;;  %1600 = vmatprep.subr.bf16.mxu0 %v1969_v43  ;;  %v1939_v28 = vcombine.high %v1179_v24, %v1183_v25  ;;  %v1233_v43 = vld [vmem:[#allocation4 + $0x1f8] sm:$0xff] }
 0x33c   :  { %1637 = vmatprep.subr.bf16.mxu1 %v1987_v39  ;;  %v1228_v39 = vld [vmem:[#allocation4 + $0x1d0] sm:$0xff]  ;;  %v1990_v45 = vcombine.low %v1229_v27, %v1233_v43  ;;  %v1991_v46 = vcombine.high %v1229_v27, %v1233_v43  ;;  %v1193_v24 = vld [vmem:[#allocation4 + $0xb8] sm:$0xff] }
 0x33d   :  { %v1988_v41 = vcombine.low %v1228_v39, %v1232_v40  ;;  %v1989_v42 = vcombine.high %v1228_v39, %v1232_v40  ;;  %v1172_v39 = vld [vmem:[#allocation4 + $0x10] sm:$0xff]  ;;  %v1173_v27 = vld [vmem:[#allocation4 + $0x18] sm:$0xff] }
 0x33e   :  { %1601 = vmatpush1.bf16.msra.mxu0 %v1968_v44  ;;  %v2308_v44 = vmov 0   ;;  %v1176_v40 = vld [vmem:[#allocation4 + $0x30] sm:$0xff] }
 0x33f   :  { %1602 = vmatprep.subr.bf16.mxu0 %v1961_v47  ;;  %1628 = vmatprep.mubr.bf16.mxu0 %v2308_v44  ;;  %v1922_v47 = vld [vmem:[%s2546_s11] ss:$0 sm:$0xff] }
 0x342   :  { %1603 = vmatpush1.bf16.msra.mxu0 %v1960_v48 }
 0x343   :  { %1604 = vmatprep.subr.bf16.mxu0 %v1953_v51 }
 0x346   :  { %1605 = vmatpush1.bf16.msra.mxu0 %v1952_v52  ;;  %v1224_v52 = vld [vmem:[#allocation4 + $0x1b0] sm:$0xff] }
 0x347   :  { %1606 = vmatprep.subr.bf16.mxu0 %v1945_v55  ;;  %v1981_v58 = vcombine.high %v1220_v50, %v1224_v52  ;;  %v1980_v1 = vcombine.low %v1220_v50, %v1224_v52 }
 0x34a   :  { %1607 = vmatpush1.bf16.msra.mxu0 %v1944_v56 }
 0x34b   :  { %1608 = vmatprep.subr.bf16.mxu0 %v1937_v59  ;;  %v1983_v59 = vcombine.high %v1221_v53, %v1225_v54 }
 0x34e   :  { %1609 = vmatpush1.bf16.msra.mxu0 %v1936_v60  ;;  %v1212_v60 = vld [vmem:[#allocation4 + $0x150] sm:$0xff] }
 0x34f   :  { %1610 = vmatprep.subr.bf16.mxu0 %v1929_v34  ;;  %v1185_v34 = vld [vmem:[#allocation4 + $0x78] sm:$0xff] }
 0x352   :  { %1611 = vmatpush1.bf16.msra.mxu0 %v1928_v36 }
 0x353   :  { %1678 = vmatprep.subr.bf16.mxu0 %v1989_v42  ;;  %v1940_v42 = vcombine.low %v1180_v31, %v1184_v32 }
 0x3ee   :  { %v1078_v62 = vpop.f32.mrf.mxu1 }
 0x3ef   :  { %v1079_v63 = vadd.f32 %v1918_v61, %v1078_v62  ;;  %v1216_v62 = vld [vmem:[#allocation4 + $0x170] sm:$0xff] }
 0x3f0   :  { %v2144_v0 = vpop.f32.mrf.mxu1  ;;  %v1972_v9 = vcombine.low %v1212_v60, %v1216_v62 }
 0x3f1   :  { %v1084_v3 = vmax.f32 %v1079_v63, 0.0  ;;  %v1213_v63 = vld [vmem:[#allocation4 + $0x158] sm:$0xff] }
 0x3f2   :  { %v1081_v4 = vpop.f32.mrf.mxu1  ;;  %v1217_v0 = vld [vmem:[#allocation4 + $0x178] sm:$0xff] }
 0x3f3   :  { %v1085_v5 = vpack.c.bf16 %v1084_v3, %v1084_v3  ;;  %v1973_v3 = vcombine.high %v1212_v60, %v1216_v62  ;;  %v1975_v4 = vcombine.high %v1213_v63, %v1217_v0  ;;  %v1246_v60 = vsub.s32 2, %v2396_v30 }
 0x3f4   :  { %v2145_v7 = vpop.f32.mrf.mxu1  ;;  %v2309_v62 = vmov 1966171168  }
 0x3f5   :  { %2155 = vmatmul.mubr.msk.bf16.vlgmr.msra.gmra.mxu1 %vm965_vm1, %v1085_v5  ;;  %v1204_v5 = vld [vmem:[#allocation4 + $0x110] sm:$0xff]  ;;  %v1205_v7 = vld [vmem:[#allocation4 + $0x118] sm:$0xff] }
 0x3f6   :  { %1638 = vmatpush1.bf16.msra.mxu1 %v1986_v38  ;;  %v1931_v38 = vcombine.high %v1171_v33, %v1175_v35  ;;  %1669 = vmatprep.mubr.bf16.mxu1 %v2308_v44  ;;  %v1967_v12 = vcombine.high %v1205_v7, %v1209_v8  ;;  %v1181_v33 = vld [vmem:[#allocation4 + $0x58] sm:$0xff] }
 0x3f7   :  { %1639 = vmatprep.subr.bf16.mxu1 %v1979_v6  ;;  %v1208_v6 = vld [vmem:[#allocation4 + $0x130] sm:$0xff]  ;;  %v1942_v43 = vcombine.low %v1181_v33, %v1185_v34 }
 0x3f8   :  { %v1964_v17 = vcombine.low %v1204_v5, %v1208_v6 }
 0x3fa   :  { %1640 = vmatpush1.bf16.msra.mxu1 %v1978_v10  ;;  %v1974_v10 = vcombine.low %v1213_v63, %v1217_v0  ;;  %v1781_v63 = vunpack.c.l.s4 %v2309_v62 }
 0x3fb   :  { %1641 = vmatprep.subr.bf16.mxu1 %v1971_v11  ;;  %v1965_v11 = vcombine.high %v1204_v5, %v1208_v6  ;;  %v1254_v6 = vsub.s32 4, %v2396_v30 }
 0x3fe   :  { %1642 = vmatpush1.bf16.msra.mxu1 %v1970_v14  ;;  %v1200_v14 = vld [vmem:[#allocation4 + $0xf0] sm:$0xff] }
 0x3ff   :  { %1643 = vmatprep.subr.bf16.mxu1 %v1963_v15  ;;  %v1197_v15 = vld [vmem:[#allocation4 + $0xd8] sm:$0xff]  ;;  %v1956_v25 = vcombine.low %v1196_v13, %v1200_v14 }
 0x400   :  { %v1959_v20 = vcombine.high %v1197_v15, %v1201_v16 }
 0x402   :  { %1644 = vmatpush1.bf16.msra.mxu1 %v1962_v18  ;;  %v1966_v18 = vcombine.low %v1205_v7, %v1209_v8  ;;  %v1262_v7 = vsub.s32 6, %v2396_v30  ;;  %v1258_v8 = vsub.s32 5, %v2396_v30 }
 0x403   :  { %1645 = vmatprep.subr.bf16.mxu1 %v1955_v19  ;;  %v1957_v19 = vcombine.high %v1196_v13, %v1200_v14 }
 0x406   :  { %1646 = vmatpush1.bf16.msra.mxu1 %v1954_v22  ;;  %v1192_v22 = vld [vmem:[#allocation4 + $0xb0] sm:$0xff] }
 0x407   :  { %1647 = vmatprep.subr.bf16.mxu1 %v1947_v23  ;;  %v1189_v23 = vld [vmem:[#allocation4 + $0x98] sm:$0xff]  ;;  %v1948_v35 = vcombine.low %v1188_v21, %v1192_v22 }
 0x408   :  { %v1950_v36 = vcombine.low %v1189_v23, %v1193_v24 }
 0x40a   :  { %1648 = vmatpush1.bf16.msra.mxu1 %v1946_v26  ;;  %v1958_v26 = vcombine.low %v1197_v15, %v1201_v16 }
 0x40b   :  { %1649 = vmatprep.subr.bf16.mxu1 %v1939_v28  ;;  %v1949_v28 = vcombine.high %v1188_v21, %v1192_v22 }
 0x40e   :  { %1650 = vmatpush1.bf16.msra.mxu1 %v1938_v29  ;;  %v1951_v29 = vcombine.high %v1189_v23, %v1193_v24 }
 0x40f   :  { %1651 = vmatprep.subr.bf16.mxu1 %v1931_v38  ;;  %v1943_v38 = vcombine.high %v1181_v33, %v1185_v34 }
 0x412   :  { %1652 = vmatpush1.bf16.msra.mxu1 %v1930_v37  ;;  %v1941_v37 = vcombine.high %v1180_v31, %v1184_v32 }
 0x413   :  { %1719 = vmatprep.subr.bf16.mxu1 %v1991_v46  ;;  %v1932_v46 = vcombine.low %v1172_v39, %v1176_v40 }
 0x4b5   :  { %v1162_v48 = vpop.f32.mrf.mxu1 }
 0x4b6   :  { %v1163_v49 = vadd.f32 %v1922_v47, %v1162_v48 }
 0x4b7   :  { %v2156_v51 = vpop.f32.mrf.mxu1 }
 0x4b8   :  { %v1168_v55 = vmax.f32 %v1163_v49, 0.0 }
 0x4b9   :  { %v1165_v56 = vpop.f32.mrf.mxu1 }
 0x4ba   :  { %v2514_v57 = vpack.c.bf16 %v1168_v55, %v1168_v55  ;;  %v1242_v56 = vsub.s32 1, %v2396_v30 }
 0x4bb   :  { %v2157_v61 = vpop.f32.mrf.mxu1 }
 0x4bc   :  { %1629 = vmatmul.mubr.bf16.vlgmr.msra.gmra.mxu0 %v2514_v57  ;;  %1670 = vmatmul.mubr.bf16.vlgmr.msra.gmra.mxu1 %v2514_v57 }
 0x4bd   :  { %1679 = vmatpush1.bf16.msra.mxu0 %v1988_v41  ;;  %1720 = vmatpush1.bf16.msra.mxu1 %v1990_v45  ;;  %v1177_v41 = vld [vmem:[#allocation4 + $0x38] sm:$0xff] }
 0x4be   :  { %1680 = vmatprep.subr.bf16.mxu0 %v1981_v58  ;;  %1721 = vmatprep.subr.bf16.mxu1 %v1983_v59  ;;  %v1935_v45 = vcombine.high %v1173_v27, %v1177_v41  ;;  %v1934_v47 = vcombine.low %v1173_v27, %v1177_v41  ;;  %v1250_v58 = vsub.s32 3, %v2396_v30  ;;  %v1238_v59 = vsub.s32 0, %v2396_v30 }
 0x4bf   :  { %1710 = vmatprep.mubr.bf16.mxu0 %v2308_v44  ;;  %1751 = vmatprep.mubr.bf16.mxu1 %v2308_v44  ;;  %v1933_v44 = vcombine.high %v1172_v39, %v1176_v40 }
 0x4c1   :  { %1681 = vmatpush1.bf16.msra.mxu0 %v1980_v1  ;;  %1722 = vmatpush1.bf16.msra.mxu1 %v1982_v2 }
 0x4c2   :  { %1682 = vmatprep.subr.bf16.mxu0 %v1973_v3  ;;  %1723 = vmatprep.subr.bf16.mxu1 %v1975_v4  ;;  %v1782_v4 = vunpack.c.0.s8 %v1781_v63 }
 0x4c4   :  { %v1785_v13 = vsub.s32 %v1782_v4, %v2396_v30 }
 0x4c5   :  { %1683 = vmatpush1.bf16.msra.mxu0 %v1972_v9  ;;  %1724 = vmatpush1.bf16.msra.mxu1 %v1974_v10  ;;  %v1266_v9 = vsub.s32 7, %v2396_v30 }
 0x4c6   :  { %1684 = vmatprep.subr.bf16.mxu0 %v1965_v11  ;;  %1725 = vmatprep.subr.bf16.mxu1 %v1967_v12 }
 0x4c9   :  { %1685 = vmatpush1.bf16.msra.mxu0 %v1964_v17  ;;  %1726 = vmatpush1.bf16.msra.mxu1 %v1966_v18 }
 0x4ca   :  { %1686 = vmatprep.subr.bf16.mxu0 %v1957_v19  ;;  %1727 = vmatprep.subr.bf16.mxu1 %v1959_v20 }
 0x4cd   :  { %1687 = vmatpush1.bf16.msra.mxu0 %v1956_v25  ;;  %1728 = vmatpush1.bf16.msra.mxu1 %v1958_v26 }
 0x4ce   :  { %1688 = vmatprep.subr.bf16.mxu0 %v1949_v28  ;;  %1729 = vmatprep.subr.bf16.mxu1 %v1951_v29 }
 0x4d1   :  { %1689 = vmatpush1.bf16.msra.mxu0 %v1948_v35  ;;  %1730 = vmatpush1.bf16.msra.mxu1 %v1950_v36 }
 0x4d2   :  { %1690 = vmatprep.subr.bf16.mxu0 %v1941_v37  ;;  %1731 = vmatprep.subr.bf16.mxu1 %v1943_v38 }
 0x4d5   :  { %1691 = vmatpush1.bf16.msra.mxu0 %v1940_v42  ;;  %1732 = vmatpush1.bf16.msra.mxu1 %v1942_v43 }
 0x4d6   :  { %1692 = vmatprep.subr.bf16.mxu0 %v1933_v44  ;;  %1733 = vmatprep.subr.bf16.mxu1 %v1935_v45 }
 0x4d9   :  { %1693 = vmatpush1.bf16.msra.mxu0 %v1932_v46  ;;  %1734 = vmatpush1.bf16.msra.mxu1 %v1934_v47 }
 0x4dc   :  { %1711 = vmatmul.mubr.bf16.vlgmr.msra.gmra.mxu0 %v2514_v57  ;;  %1752 = vmatmul.mubr.bf16.vlgmr.msra.gmra.mxu1 %v2514_v57  ;;  %v1234_v57 = vld [vmem:[%s2548_s13] sm:$0xff] }
 0x4dd   :  { %v1243_v61 = vrot.slane %v1234_v57, %v1242_v56  ;;  %v1251_v0 = vrot.slane %v1234_v57, %v1250_v58  ;;  %v1239_v1 = vrot.slane %v1234_v57, %v1238_v59  ;;  %v1247_v2 = vrot.slane %v1234_v57, %v1246_v60 }
 0x4de   :  { %v1255_v15 = vrot.slane %v1234_v57, %v1254_v6  ;;  %v1263_v16 = vrot.slane %v1234_v57, %v1262_v7  ;;  %v1259_v17 = vrot.slane %v1234_v57, %v1258_v8  ;;  %v1267_v18 = vrot.slane %v1234_v57, %v1266_v9 }
 0x57c   :  { %v1630_v48 = vpop.f32.mrf.mxu0  ;;  %v1671_v49 = vpop.f32.mrf.mxu1 }
 0x57d   :  { %v1631_v10 = vadd.f32 %v1630_v48, %v1239_v1  ;;  %v1672_v11 = vadd.f32 %v1671_v49, %v1247_v2 }
 0x57e   :  { %v1632_v50 = vpop.f32.mrf.mxu0  ;;  %v1673_v51 = vpop.f32.mrf.mxu1 }
 0x57f   :  { %v1633_v3 = vadd.f32 %v1632_v50, %v1243_v61  ;;  %v1674_v5 = vadd.f32 %v1673_v51, %v1251_v0 }
 0x580   :  { %v1634_v52 = vpop.f32.mrf.mxu0  ;;  %v1675_v53 = vpop.f32.mrf.mxu1 }
 0x581   :  { %v1992_v12 = vpack.c.bf16 %v1633_v3, %v1631_v10  ;;  %v1993_v14 = vpack.c.bf16 %v1674_v5, %v1672_v11 }
 0x582   :  { %v1635_v54 = vpop.f32.mrf.mxu0  ;;  %v1676_v55 = vpop.f32.mrf.mxu1 }
 0x583   :  { %v1786_v21 = vrot.slane %v1992_v12, %v1785_v13  ;;  %v1793_v22 = vrot.slane %v1993_v14, %v1785_v13 }
 0x585   :  { %v1808_v36 = vcombine.low %v1786_v21, %v1793_v22 }
 0x587   :  { %v1816_v40 = vrot.slane %v1808_v36, %v1785_v13 }
 0x59c   :  { %v1712_v19 = vpop.f32.mrf.mxu0  ;;  %v1753_v20 = vpop.f32.mrf.mxu1 }
 0x59d   :  { %v1713_v25 = vadd.f32 %v1712_v19, %v1255_v15  ;;  %v1754_v26 = vadd.f32 %v1753_v20, %v1263_v16 }
 0x59e   :  { %v1714_v23 = vpop.f32.mrf.mxu0  ;;  %v1755_v24 = vpop.f32.mrf.mxu1 }
 0x59f   :  { %v1715_v28 = vadd.f32 %v1714_v23, %v1259_v17  ;;  %v1756_v29 = vadd.f32 %v1755_v24, %v1267_v18 }
 0x5a0   :  { %v1716_v31 = vpop.f32.mrf.mxu0  ;;  %v1757_v32 = vpop.f32.mrf.mxu1 }
 0x5a1   :  { %v1994_v33 = vpack.c.bf16 %v1715_v28, %v1713_v25  ;;  %v1995_v34 = vpack.c.bf16 %v1756_v29, %v1754_v26 }
 0x5a2   :  { %v1717_v30 = vpop.f32.mrf.mxu0  ;;  %v1758_v35 = vpop.f32.mrf.mxu1 }
 0x5a3   :  { %v1800_v37 = vrot.slane %v1994_v33, %v1785_v13  ;;  %v1807_v38 = vrot.slane %v1995_v34, %v1785_v13 }
 0x5a5   :  { %v1809_v39 = vcombine.low %v1800_v37, %v1807_v38 }
 0x5a7   :  { %v1823_v27 = vrot.slane %v1809_v39, %v1785_v13 }
 0x5a9   :  { %v1824_v41 = vcombine.low %v1816_v40, %v1823_v27 }
 0x5ab   :  { %1826 = vst [vmem:[%s2549_s14] sm:$0xff] %v1824_v41 }
 0x5ac   :  { %1836 = vsyncpa [#allocation3], 1 }
 0x5ad   :  { %1837 = vsyncpa [#allocation5], 1 }

</bundles_post_ra>
